<compile_context>
chip_gen: v5e
topology: v5e:2x2
jax: 0.10.0
libtpu: 0.0.40
codegen_flags: <defaults>
</compile_context>

<pallas_src>
import functools

import jax
import jax.numpy as jnp
from jax import lax
from jax.experimental import pallas as pl
from jax.experimental.pallas import tpu as pltpu


def _round_up(x, m):
    return (x + m - 1) // m * m


_VMEM_LIMIT = 40 * 1024 * 1024          # <= 48 MiB: safe on v7x, fine on v5e/v6e
_TILE_TARGET_BYTES = 2 * 1024 * 1024    # f32-equivalent logits bytes per tile


# ---------------------------------------------------------------------------
# Kernel A: lane-dense layout for small class counts (C < 128).
#   logits_ref: (C, tile_n)    native dtype (batch on lanes)
#   labels_ref: (1, tile_n)    int32
#   out_ref   : (1, n_bins, 3) f32 accumulator: [count, sum_conf, sum_acc]
# ---------------------------------------------------------------------------
def ece_cn_kernel(logits_ref, labels_ref, out_ref, *, n_bins, n_valid,
                  tile_n, steps):
    s = pl.program_id(0)          # parallel shard (TensorCore)
    i = pl.program_id(1)          # sequential step within the shard

    @pl.when(i == 0)
    def _():
        out_ref[...] = jnp.zeros_like(out_ref)

    x = logits_ref[...].astype(jnp.float32)                      # (C, TN)
    num_classes = x.shape[0]

    # confidence = max softmax prob = 1 / sum(exp(x - max)); exact divide so
    # bin membership matches the reference.
    m = jnp.max(x, axis=0, keepdims=True)                        # (1, TN)
    denom = jnp.sum(jnp.exp(x - m), axis=0, keepdims=True)       # (1, TN)
    conf = 1.0 / denom                                           # (1, TN)

    # first-occurrence argmax of raw logits (== argmax of softmax).
    row = lax.broadcasted_iota(jnp.int32, x.shape, 0)            # (C, TN)
    pred = jnp.min(jnp.where(x == m, row, num_classes), axis=0,
                   keepdims=True)                                # (1, TN)
    accf = (pred == labels_ref[...]).astype(jnp.float32)         # (1, TN)

    # ragged tail / out-of-range-step mask (no wrapper padding).
    base = (s * steps + i) * tile_n
    lane = lax.broadcasted_iota(jnp.int32, (1, tile_n), 1)
    valid = (base + lane) < n_valid                              # (1, TN) bool

    # zero conf/acc under ~valid BEFORE any products so garbage tail data
    # (NaN/inf from uninitialized VMEM) cannot poison the sums.
    conf = jnp.where(valid, conf, 0.0)
    accf = jnp.where(valid, accf, 0.0)

    # direct bin index: conf in (k/nb, (k+1)/nb]  <=>  ceil(conf*nb)-1 == k
    nb = float(n_bins)
    binf = jnp.clip(jnp.ceil(conf * nb) - 1.0, 0.0, nb - 1.0)    # (1, TN)

    k = lax.broadcasted_iota(jnp.int32, (n_bins, 1), 0).astype(jnp.float32)
    eqv = jnp.logical_and(binf == k, valid)                      # (n_bins, TN)

    cnt_p = jnp.sum(jnp.where(eqv, 1.0, 0.0), axis=1, keepdims=True)
    sconf_p = jnp.sum(jnp.where(eqv, conf, 0.0), axis=1, keepdims=True)
    sacc_p = jnp.sum(jnp.where(eqv, accf, 0.0), axis=1, keepdims=True)

    k3 = lax.broadcasted_iota(jnp.int32, (1, 3), 1)
    upd = (jnp.where(k3 == 0, cnt_p, 0.0)
           + jnp.where(k3 == 1, sconf_p, 0.0)
           + jnp.where(k3 == 2, sacc_p, 0.0))                    # (n_bins, 3)
    out_ref[...] = out_ref[...] + upd[None, :, :]


# ---------------------------------------------------------------------------
# Kernel B: row-tiled [N, C] layout for large class counts (C >= 128).
#   logits_ref: (tile_n, C)    native dtype
#   labels_ref: (tile_n, 1)    int32
#   out_ref   : (1, 3, n_bins) f32 accumulator: [count, sum_conf, sum_acc]
# ---------------------------------------------------------------------------
def ece_nc_kernel(logits_ref, labels_ref, out_ref, *, n_bins, n_valid,
                  tile_n, steps):
    s = pl.program_id(0)
    i = pl.program_id(1)

    @pl.when(i == 0)
    def _():
        out_ref[...] = jnp.zeros_like(out_ref)

    x = logits_ref[...].astype(jnp.float32)                      # (TN, C)
    num_classes = x.shape[1]

    m = jnp.max(x, axis=1, keepdims=True)                        # (TN, 1)
    denom = jnp.sum(jnp.exp(x - m), axis=1, keepdims=True)       # (TN, 1)
    conf = 1.0 / denom                                           # (TN, 1)

    col = lax.broadcasted_iota(jnp.int32, x.shape, 1)            # (TN, C)
    pred = jnp.min(jnp.where(x == m, col, num_classes), axis=1,
                   keepdims=True)                                # (TN, 1)
    accf = (pred == labels_ref[...]).astype(jnp.float32)         # (TN, 1)

    base = (s * steps + i) * tile_n
    rowid = lax.broadcasted_iota(jnp.int32, (tile_n, 1), 0)
    valid = (base + rowid) < n_valid                             # (TN, 1) bool

    conf = jnp.where(valid, conf, 0.0)
    accf = jnp.where(valid, accf, 0.0)

    nb = float(n_bins)
    binf = jnp.clip(jnp.ceil(conf * nb) - 1.0, 0.0, nb - 1.0)    # (TN, 1)

    k = lax.broadcasted_iota(jnp.int32, (1, n_bins), 1).astype(jnp.float32)
    eqv = jnp.logical_and(binf == k, valid)                      # (TN, n_bins)

    cnt_p = jnp.sum(jnp.where(eqv, 1.0, 0.0), axis=0, keepdims=True)
    sconf_p = jnp.sum(jnp.where(eqv, conf, 0.0), axis=0, keepdims=True)
    sacc_p = jnp.sum(jnp.where(eqv, accf, 0.0), axis=0, keepdims=True)

    k3 = lax.broadcasted_iota(jnp.int32, (3, 1), 0)
    upd = (jnp.where(k3 == 0, cnt_p, 0.0)
           + jnp.where(k3 == 1, sconf_p, 0.0)
           + jnp.where(k3 == 2, sacc_p, 0.0))                    # (3, n_bins)
    out_ref[...] = out_ref[...] + upd[None, :, :]


# ---------------------------------------------------------------------------
# Wrappers
# ---------------------------------------------------------------------------
def _ece_partials_cn(logits, labels, n_bins, tile_n, n_shards):
    """Lane-dense path (C < 128): logits transposed to [C, N]. No padding."""
    N, C = logits.shape
    if tile_n is None:
        # bytes-driven: ~2 MiB of f32-equivalent logits per tile.
        tile_n = _TILE_TARGET_BYTES // (C * 4)
    tile_n = max(128, _round_up(min(tile_n, 65536), 128))
    tile_n = min(tile_n, _round_up(N, 128))

    num_tiles = pl.cdiv(N, tile_n)
    n_shards = max(1, min(n_shards, num_tiles))
    steps = pl.cdiv(num_tiles, n_shards)

    # native dtype preserved; NO batch padding (tail handled in-kernel).
    # TODO(synk): fold this transpose into the kernel to drop the extra HBM pass.
    logits_t = jnp.transpose(logits)                 # (C, N)
    labels2d = labels.reshape(1, N)

    def idx(s, i):
        # clamp fully out-of-range steps to the last real block (masked inside).
        t = jnp.minimum(s * steps + i, num_tiles - 1)
        return (0, t)

    kernel = functools.partial(ece_cn_kernel, n_bins=n_bins, n_valid=N,
                               tile_n=tile_n, steps=steps)
    out = pl.pallas_call(
        kernel,
        out_shape=jax.ShapeDtypeStruct((n_shards, n_bins, 3), jnp.float32),
        grid_spec=pltpu.PrefetchScalarGridSpec(
            num_scalar_prefetch=0,
            grid=(n_shards, steps),
            in_specs=[
                pl.BlockSpec((C, tile_n), idx),
                pl.BlockSpec((1, tile_n), idx),
            ],
            out_specs=pl.BlockSpec((1, n_bins, 3), lambda s, i: (s, 0, 0)),
        ),
        compiler_params=pltpu.CompilerParams(
            dimension_semantics=("parallel", "arbitrary"),
            vmem_limit_bytes=_VMEM_LIMIT),
    )(logits_t, labels2d)

    summed = jnp.sum(out, axis=0)                  # (n_bins, 3)
    return summed[:, 0], summed[:, 1], summed[:, 2]


def _ece_partials_nc(logits, labels, n_bins, tile_n, n_shards):
    """Row-tiled path (C >= 128): logits stay [N, C]. No wrapper copies."""
    N, C = logits.shape
    if tile_n is None:
        # ~2 MiB f32-equivalent per logits tile; the in-kernel f32/iota/one-hot
        # temporaries multiply that by ~5-8x, which stays under the 40 MiB limit.
        tile_n = _TILE_TARGET_BYTES // (C * 4)
    tile_n = max(8, _round_up(min(max(tile_n, 8), 4096), 8))
    tile_n = min(tile_n, _round_up(N, 8))

    num_tiles = pl.cdiv(N, tile_n)
    n_shards = max(1, min(n_shards, num_tiles))
    steps = pl.cdiv(num_tiles, n_shards)

    labels2d = labels.reshape(N, 1)

    def idx(s, i):
        t = jnp.minimum(s * steps + i, num_tiles - 1)
        return (t, 0)

    kernel = functools.partial(ece_nc_kernel, n_bins=n_bins, n_valid=N,
                               tile_n=tile_n, steps=steps)
    out = pl.pallas_call(
        kernel,
        out_shape=jax.ShapeDtypeStruct((n_shards, 3, n_bins), jnp.float32),
        grid_spec=pltpu.PrefetchScalarGridSpec(
            num_scalar_prefetch=0,
            grid=(n_shards, steps),
            in_specs=[
                pl.BlockSpec((tile_n, C), idx),
                pl.BlockSpec((tile_n, 1), idx),
            ],
            out_specs=pl.BlockSpec((1, 3, n_bins), lambda s, i: (s, 0, 0)),
        ),
        compiler_params=pltpu.CompilerParams(
            dimension_semantics=("parallel", "arbitrary"),
            vmem_limit_bytes=_VMEM_LIMIT),
    )(logits, labels2d)

    summed = jnp.sum(out, axis=0)                  # (3, n_bins)
    return summed[0], summed[1], summed[2]


def ece_pallas(logits, labels, n_bins=15, tile_n=None, n_shards=2):
    """Expected Calibration Error. logits: [N, C] float, labels: [N] int."""
    N, C = logits.shape
    labels = labels.astype(jnp.int32)

    if C < 128:
        cnt, sconf, sacc = _ece_partials_cn(logits, labels, n_bins, tile_n,
                                            n_shards)
    else:
        cnt, sconf, sacc = _ece_partials_nc(logits, labels, n_bins, tile_n,
                                            n_shards)

    # tiny 15-bin finalize in plain JAX on the per-bin partial sums.
    prop = cnt / jnp.float32(N)
    denom = jnp.maximum(cnt, 1.0)
    contrib = jnp.where(cnt > 0.0,
                        jnp.abs(sconf / denom - sacc / denom) * prop, 0.0)
    return jnp.sum(contrib).reshape(1)            # matches torch: shape (1,)


def ece_reference(logits, labels, n_bins=15):
    """Plain-JAX reference mirroring the PyTorch module."""
    softmaxes = jax.nn.softmax(logits.astype(jnp.float32), axis=1)
    confidences = jnp.max(softmaxes, axis=1)
    predictions = jnp.argmax(softmaxes, axis=1)
    accuracies = (predictions == labels).astype(jnp.float32)
    boundaries = jnp.linspace(0.0, 1.0, n_bins + 1, dtype=jnp.float32)
    ece = jnp.zeros((1,), jnp.float32)
    n = logits.shape[0]
    for b in range(n_bins):
        lo, hi = boundaries[b], boundaries[b + 1]
        in_bin = jnp.logical_and(confidences > lo, confidences <= hi)
        cnt = jnp.sum(in_bin.astype(jnp.float32))
        prop = cnt / n
        denom = jnp.maximum(cnt, 1.0)
        avg_acc = jnp.sum(accuracies * in_bin) / denom
        avg_conf = jnp.sum(confidences * in_bin) / denom
        ece = ece + jnp.where(cnt > 0, jnp.abs(avg_conf - avg_acc) * prop, 0.0)
    return ece


if __name__ == "__main__":
    key = jax.random.PRNGKey(0)
    k1, k2, k3, k4 = jax.random.split(key, 4)

    # Path 1: small class count -> lane-dense [C, N] kernel.
    # N is not a multiple of the tile (exercises the boundary mask and the
    # clamped out-of-range grid step) with a (parallel, arbitrary) grid.
    N1, C1 = 300, 16
    logits1 = jax.random.normal(k1, (N1, C1), dtype=jnp.float32) * 2.0
    labels1 = jax.random.randint(k2, (N1,), 0, C1, dtype=jnp.int32)
    ece1 = ece_pallas(logits1, labels1, tile_n=128, n_shards=2)
    jax.block_until_ready(ece1)
    ref1 = ece_reference(logits1, labels1)
    assert jnp.allclose(ece1, ref1, rtol=1e-4, atol=1e-5), (ece1, ref1)

    # Path 1 again with the bytes-driven default tile size.
    ece1b = ece_pallas(logits1, labels1)
    jax.block_until_ready(ece1b)
    assert jnp.allclose(ece1b, ref1, rtol=1e-4, atol=1e-5), (ece1b, ref1)

    # Path 2: class count >= 128 -> row-tiled [N, C] kernel (no wrapper copies).
    N2, C2 = 100, 128
    logits2 = jax.random.normal(k3, (N2, C2), dtype=jnp.float32) * 2.0
    labels2 = jax.random.randint(k4, (N2,), 0, C2, dtype=jnp.int32)
    ece2 = ece_pallas(logits2, labels2, tile_n=32, n_shards=2)
    jax.block_until_ready(ece2)
    ref2 = ece_reference(logits2, labels2)
    assert jnp.allclose(ece2, ref2, rtol=1e-4, atol=1e-5), (ece2, ref2)

    print("KERNEL_OK")
</pallas_src>

<mosaic_0001>
module attributes {stable_mosaic.version = 11 : i64} {
  func.func @ece_cn_kernel(%arg0: i32, %arg1: i32, %arg2: memref<16x128xf32, #tpu.memory_space<vmem>>, %arg3: memref<1x128xi32, #tpu.memory_space<vmem>>, %arg4: memref<1x15x3xf32, #tpu.memory_space<vmem>>) attributes {dimension_semantics = [#tpu.dimension_semantics<parallel>, #tpu.dimension_semantics<arbitrary>], iteration_bounds = array<i64: 2, 2>, scalar_prefetch = 0 : i64, scratch_operands = 0 : i64, tpu.core_type = #tpu.core_type<tc>, window_params = [{transform_indices = @transform_0, window_bounds = array<i64: 16, 128>}, {transform_indices = @transform_1, window_bounds = array<i64: 1, 128>}, {transform_indices = @transform_2, window_bounds = array<i64: 1, 15, 3>}]} {
    %c0_i32 = arith.constant 0 : i32
    %0 = arith.cmpi eq, %arg1, %c0_i32 : i32
    %1 = arith.extui %0 : i1 to i32
    %c0_i32_0 = arith.constant 0 : i32
    %2 = arith.cmpi ne, %1, %c0_i32_0 : i32
    scf.if %2 {
      %cst_31 = arith.constant 0.000000e+00 : f32
      %100 = vector.broadcast %cst_31 : f32 to vector<1x15x3xf32>
      %c0_32 = arith.constant 0 : index
      %c0_33 = arith.constant 0 : index
      %c0_34 = arith.constant 0 : index
      %101 = vector.load %arg4[%c0_32, %c0_33, %c0_34] : memref<1x15x3xf32, #tpu.memory_space<vmem>>, vector<1x15x3xf32>
      tpu.vector_store %arg4[%c0_32, %c0_33, %c0_34], %100 {strides = array<i32>} : memref<1x15x3xf32, #tpu.memory_space<vmem>>, vector<1x15x3xf32>,
    } else {
    }
    %c0 = arith.constant 0 : index
    %c0_1 = arith.constant 0 : index
    %3 = vector.load %arg2[%c0, %c0_1] : memref<16x128xf32, #tpu.memory_space<vmem>>, vector<16x128xf32>
    %cst = arith.constant dense<0xFF800000> : vector<128xf32>
    %4 = vector.multi_reduction <maximumf>, %3, %cst [0] : vector<16x128xf32> to vector<128xf32>
    %5 = vector.shape_cast %4 : vector<128xf32> to vector<1x128xf32>
    %6 = vector.broadcast %5 : vector<1x128xf32> to vector<16x128xf32>
    %7 = arith.subf %3, %6 : vector<16x128xf32>
    %8 = math.exp %7 : vector<16x128xf32>
    %cst_2 = arith.constant dense<0.000000e+00> : vector<128xf32>
    %9 = vector.multi_reduction <add>, %8, %cst_2 [0] : vector<16x128xf32> to vector<128xf32>
    %10 = vector.shape_cast %9 : vector<128xf32> to vector<1x128xf32>
    %cst_3 = arith.constant 1.000000e+00 : f32
    %11 = vector.broadcast %cst_3 : f32 to vector<1x128xf32>
    %12 = arith.divf %11, %10 : vector<1x128xf32>
    %13 = tpu.iota {dimensions = array<i32: 0>} : vector<16x128xi32>
    %14 = vector.broadcast %5 : vector<1x128xf32> to vector<16x128xf32>
    %15 = arith.cmpf oeq, %3, %14 : vector<16x128xf32>
    %c16_i32 = arith.constant 16 : i32
    %16 = vector.broadcast %c16_i32 : i32 to vector<16x128xi32>
    %17 = arith.select %15, %13, %16 : vector<16x128xi1>, vector<16x128xi32>
    %cst_4 = arith.constant dense<2147483647> : vector<128xi32>
    %18 = vector.multi_reduction <minsi>, %17, %cst_4 [0] : vector<16x128xi32> to vector<128xi32>
    %19 = vector.shape_cast %18 : vector<128xi32> to vector<1x128xi32>
    %c0_5 = arith.constant 0 : index
    %c0_6 = arith.constant 0 : index
    %20 = vector.load %arg3[%c0_5, %c0_6] : memref<1x128xi32, #tpu.memory_space<vmem>>, vector<1x128xi32>
    %21 = arith.cmpi eq, %19, %20 : vector<1x128xi32>
    %22 = arith.extui %21 : vector<1x128xi1> to vector<1x128xi32>
    %23 = arith.sitofp %22 : vector<1x128xi32> to vector<1x128xf32>
    %c2_i32 = arith.constant 2 : i32
    %24 = arith.muli %arg0, %c2_i32 : i32
    %25 = arith.addi %24, %arg1 : i32
    %c128_i32 = arith.constant 128 : i32
    %26 = arith.muli %25, %c128_i32 : i32
    %27 = tpu.iota {dimensions = array<i32: 1>} : vector<1x128xi32>
    %28 = vector.broadcast %26 : i32 to vector<1x128xi32>
    %29 = arith.addi %28, %27 : vector<1x128xi32>
    %c300_i32 = arith.constant 300 : i32
    %30 = vector.broadcast %c300_i32 : i32 to vector<1x128xi32>
    %31 = arith.cmpi slt, %29, %30 : vector<1x128xi32>
    %cst_7 = arith.constant 0.000000e+00 : f32
    %32 = vector.broadcast %cst_7 : f32 to vector<1x128xf32>
    %33 = arith.select %31, %12, %32 : vector<1x128xi1>, vector<1x128xf32>
    %cst_8 = arith.constant 0.000000e+00 : f32
    %34 = vector.broadcast %cst_8 : f32 to vector<1x128xf32>
    %35 = arith.select %31, %23, %34 : vector<1x128xi1>, vector<1x128xf32>
    %cst_9 = arith.constant 1.500000e+01 : f32
    %36 = vector.broadcast %cst_9 : f32 to vector<1x128xf32>
    %37 = arith.mulf %33, %36 : vector<1x128xf32>
    %38 = math.ceil %37 : vector<1x128xf32>
    %cst_10 = arith.constant 1.000000e+00 : f32
    %39 = vector.broadcast %cst_10 : f32 to vector<1x128xf32>
    %40 = arith.subf %38, %39 : vector<1x128xf32>
    %cst_11 = arith.constant 0.000000e+00 : f32
    %cst_12 = arith.constant 1.400000e+01 : f32
    %41 = vector.broadcast %cst_11 : f32 to vector<1x128xf32>
    %42 = arith.maximumf %41, %40 : vector<1x128xf32>
    %43 = vector.broadcast %cst_12 : f32 to vector<1x128xf32>
    %44 = arith.minimumf %43, %42 : vector<1x128xf32>
    %45 = tpu.iota {dimensions = array<i32: 0>} : vector<15x1xi32>
    %46 = arith.sitofp %45 : vector<15x1xi32> to vector<15x1xf32>
    %47 = vector.broadcast %44 : vector<1x128xf32> to vector<15x128xf32>
    %48 = vector.broadcast %46 : vector<15x1xf32> to vector<15x128xf32>
    %49 = arith.cmpf oeq, %47, %48 : vector<15x128xf32>
    %50 = vector.broadcast %31 : vector<1x128xi1> to vector<15x128xi1>
    %51 = arith.andi %49, %50 : vector<15x128xi1>
    %cst_13 = arith.constant 1.000000e+00 : f32
    %cst_14 = arith.constant 0.000000e+00 : f32
    %52 = vector.broadcast %cst_13 : f32 to vector<15x128xf32>
    %53 = vector.broadcast %cst_14 : f32 to vector<15x128xf32>
    %54 = arith.select %51, %52, %53 : vector<15x128xi1>, vector<15x128xf32>
    %cst_15 = arith.constant dense<0.000000e+00> : vector<15xf32>
    %55 = vector.multi_reduction <add>, %54, %cst_15 [1] : vector<15x128xf32> to vector<15xf32>
    %56 = vector.shape_cast %55 : vector<15xf32> to vector<15x1xf32>
    %cst_16 = arith.constant 0.000000e+00 : f32
    %57 = vector.shape_cast %33 : vector<1x128xf32> to vector<1x128xf32>
    %58 = vector.broadcast %57 : vector<1x128xf32> to vector<15x128xf32>
    %59 = vector.broadcast %cst_16 : f32 to vector<15x128xf32>
    %60 = arith.select %51, %58, %59 : vector<15x128xi1>, vector<15x128xf32>
    %cst_17 = arith.constant dense<0.000000e+00> : vector<15xf32>
    %61 = vector.multi_reduction <add>, %60, %cst_17 [1] : vector<15x128xf32> to vector<15xf32>
    %62 = vector.shape_cast %61 : vector<15xf32> to vector<15x1xf32>
    %cst_18 = arith.constant 0.000000e+00 : f32
    %63 = vector.shape_cast %35 : vector<1x128xf32> to vector<1x128xf32>
    %64 = vector.broadcast %63 : vector<1x128xf32> to vector<15x128xf32>
    %65 = vector.broadcast %cst_18 : f32 to vector<15x128xf32>
    %66 = arith.select %51, %64, %65 : vector<15x128xi1>, vector<15x128xf32>
    %cst_19 = arith.constant dense<0.000000e+00> : vector<15xf32>
    %67 = vector.multi_reduction <add>, %66, %cst_19 [1] : vector<15x128xf32> to vector<15xf32>
    %68 = vector.shape_cast %67 : vector<15xf32> to vector<15x1xf32>
    %69 = tpu.iota {dimensions = array<i32: 1>} : vector<1x3xi32>
    %c0_i32_20 = arith.constant 0 : i32
    %70 = vector.broadcast %c0_i32_20 : i32 to vector<1x3xi32>
    %71 = arith.cmpi eq, %69, %70 : vector<1x3xi32>
    %cst_21 = arith.constant 0.000000e+00 : f32
    %72 = vector.shape_cast %71 : vector<1x3xi1> to vector<1x3xi1>
    %73 = vector.broadcast %72 : vector<1x3xi1> to vector<15x3xi1>
    %74 = vector.shape_cast %56 : vector<15x1xf32> to vector<15x1xf32>
    %75 = vector.broadcast %74 : vector<15x1xf32> to vector<15x3xf32>
    %76 = vector.broadcast %cst_21 : f32 to vector<15x3xf32>
    %77 = arith.select %73, %75, %76 : vector<15x3xi1>, vector<15x3xf32>
    %c1_i32 = arith.constant 1 : i32
    %78 = vector.broadcast %c1_i32 : i32 to vector<1x3xi32>
    %79 = arith.cmpi eq, %69, %78 : vector<1x3xi32>
    %cst_22 = arith.constant 0.000000e+00 : f32
    %80 = vector.shape_cast %79 : vector<1x3xi1> to vector<1x3xi1>
    %81 = vector.broadcast %80 : vector<1x3xi1> to vector<15x3xi1>
    %82 = vector.shape_cast %62 : vector<15x1xf32> to vector<15x1xf32>
    %83 = vector.broadcast %82 : vector<15x1xf32> to vector<15x3xf32>
    %84 = vector.broadcast %cst_22 : f32 to vector<15x3xf32>
    %85 = arith.select %81, %83, %84 : vector<15x3xi1>, vector<15x3xf32>
    %86 = arith.addf %77, %85 : vector<15x3xf32>
    %c2_i32_23 = arith.constant 2 : i32
    %87 = vector.broadcast %c2_i32_23 : i32 to vector<1x3xi32>
    %88 = arith.cmpi eq, %69, %87 : vector<1x3xi32>
    %cst_24 = arith.constant 0.000000e+00 : f32
    %89 = vector.shape_cast %88 : vector<1x3xi1> to vector<1x3xi1>
    %90 = vector.broadcast %89 : vector<1x3xi1> to vector<15x3xi1>
    %91 = vector.shape_cast %68 : vector<15x1xf32> to vector<15x1xf32>
    %92 = vector.broadcast %91 : vector<15x1xf32> to vector<15x3xf32>
    %93 = vector.broadcast %cst_24 : f32 to vector<15x3xf32>
    %94 = arith.select %90, %92, %93 : vector<15x3xi1>, vector<15x3xf32>
    %95 = arith.addf %86, %94 : vector<15x3xf32>
    %c0_25 = arith.constant 0 : index
    %c0_26 = arith.constant 0 : index
    %c0_27 = arith.constant 0 : index
    %96 = vector.load %arg4[%c0_25, %c0_26, %c0_27] : memref<1x15x3xf32, #tpu.memory_space<vmem>>, vector<1x15x3xf32>
    %97 = vector.shape_cast %95 : vector<15x3xf32> to vector<1x15x3xf32>
    %98 = arith.addf %96, %97 : vector<1x15x3xf32>
    %c0_28 = arith.constant 0 : index
    %c0_29 = arith.constant 0 : index
    %c0_30 = arith.constant 0 : index
    %99 = vector.load %arg4[%c0_28, %c0_29, %c0_30] : memref<1x15x3xf32, #tpu.memory_space<vmem>>, vector<1x15x3xf32>
    tpu.vector_store %arg4[%c0_28, %c0_29, %c0_30], %98 {strides = array<i32>} : memref<1x15x3xf32, #tpu.memory_space<vmem>>, vector<1x15x3xf32>,
    return
  }
  func.func @transform_0(%arg0: i32, %arg1: i32) -> (i32, i32) {
    %c2_i32 = arith.constant 2 : i32
    %0 = arith.muli %arg0, %c2_i32 : i32
    %1 = arith.addi %0, %arg1 : i32
    %c2_i32_0 = arith.constant 2 : i32
    %2 = arith.minsi %1, %c2_i32_0 : i32
    %c0_i32 = arith.constant 0 : i32
    %c0_i32_1 = arith.constant 0 : i32
    return %c0_i32, %2 : i32, i32
  }
  func.func @transform_1(%arg0: i32, %arg1: i32) -> (i32, i32) {
    %c2_i32 = arith.constant 2 : i32
    %0 = arith.muli %arg0, %c2_i32 : i32
    %1 = arith.addi %0, %arg1 : i32
    %c2_i32_0 = arith.constant 2 : i32
    %2 = arith.minsi %1, %c2_i32_0 : i32
    %c0_i32 = arith.constant 0 : i32
    %c0_i32_1 = arith.constant 0 : i32
    return %c0_i32, %2 : i32, i32
  }
  func.func @transform_2(%arg0: i32, %arg1: i32) -> (i32, i32, i32) {
    %c0_i32 = arith.constant 0 : i32
    %c0_i32_0 = arith.constant 0 : i32
    %c0_i32_1 = arith.constant 0 : i32
    return %arg0, %c0_i32, %c0_i32_0 : i32, i32, i32
  }
}

</mosaic_0001>

<bundles_post_ra>
// kernel: tpu_custom_call.1
= control target key start
LH: loop header
LB: loop body
LE: loop exit
PB: predicated region body
PF: predicated region fallthrough
CT: control target
= control target key end

     0   :  { %7 = vsyncpa [#allocation3], 0  ;;  %s931_s0 = inlined_call_operand.hbm [shape: f32[16,300], index: 0, kind: input, shape index: {}]   ;;  %s932_s1 = inlined_call_operand.hbm [shape: s32[1,300], index: 1, kind: input, shape index: {}]   ;;  %s933_s2 = inlined_call_operand.vmem [shape: f32[2,15,3], index: 2, kind: output, shape index: {}]  }
   0x1   :  { %9 = vsyncpa [#allocation3 + $0x1], 0 }
   0x2   :  { %10 = vsyncpa [#allocation5], 0 }
   0x3   :  { %12 = vsyncpa [#allocation5 + $0x1], 0  ;;  %s744_s9 = smov 0   ;;  %s746_s10 = smov 0  }
   0x4   :  { %s748_s11 = smov 0   ;;  %s750_s12 = smov 0  }
   0x5   :  { %s752_s13 = smov 0   ;;  %s754_s14 = smov 0  }
   0x6   :  { %s756_s15 = smov 0   ;;  %s758_s16 = smov 0  }
   0x7 LB: > { %s481_s17 = sadd.s32 4294967295, %s722_s16   ;;  %s27_s18 = sadd.s32 1, %s714_s14  ;;  %s722_s16 = sphi %s758_s16, %s18_s16   ;;  %s718_s15 = sphi %s756_s15, %s943_s15   ;;  %s714_s14 = sphi %s754_s14, %s942_s14   ;;  %s710_s13 = sphi %s752_s13, %s941_s13   ;;  %s706_s12 = sphi %s750_s12, %s940_s12   ;;  %s702_s11 = sphi %s748_s11, %s939_s11   ;;  %s698_s10 = sphi %s746_s10, %s938_s10   ;;  %s694_s9 = sphi %s744_s9, %s937_s9  }
   0x8   : > { %p28_p0 = scmp.ge.s32.totalorder %s27_s18, 2  ;;  %s30_s19 = sadd.s32 1, %s718_s15 }
   0x9   : > { %s483_s20 = sshll.u32 %s718_s15, 1  ;;  %s45_s21 = sadd.s32 1, %s702_s11 }
   0xa   : > { %s945_s18 = smov (%p28_p0, %s27_s18), 0  ;;  %s947_s19 = smov (!%p28_p0, %s30_s19), %s718_s15 }
   0xb   : > { %s35_s22 = sadd.s32 %s714_s14, %s483_s20  ;;  %p52_p1 = scmp.ne.s32.totalorder %s702_s11, %s698_s10 }
   0xc   : > { %p32_p2 = scmp.ge.s32.totalorder %s947_s19, 2  ;;  %p36_p3 = scmp.lt.s32.totalorder %s35_s22, 2 }
   0xd   : > { %p53_p4 = scmp.eq.s32.totalorder %s722_s16, 0  ;;  %p58_p5 = scmp.ne.s32.totalorder %s698_s10, %s694_s9 }
   0xe   : > { %s949_s19 = smov (%p32_p2, %s947_s19), 0  ;;  %s951_s22 = smov (!%p36_p3, %s35_s22), 2 }
   0xf   : > { %s484_s23 = sshll.u32 %s949_s19, 1  ;;  %p800_p6 = por %p53_p4, %p52_p1 }
  0x10   : > { %s39_s25 = sadd.s32 %s484_s23, %s945_s18  ;;  %p59_p7 = scmp.eq.s32.totalorder %s481_s17, 0 }
  0x11   : > { %p40_p8 = scmp.lt.s32.totalorder %s39_s25, 2  ;;  %p516_p10 = scmp.lt.s32.totalorder %s722_s16, 4 }
  0x12   : > { %p805_p9 = por %p59_p7, %p58_p5  ;;  %s811_s27 = sand.u32 1, %s702_s11  }
  0x13   : > { %s953_s25 = smov (!%p40_p8, %s39_s25), 2  ;;  %s491_s28 = sshll.u32 %s951_s22, 3 }
  0x14   : > { %s42_s29 = ssub.s32 %s951_s22, %s953_s25  ;;  %s489_s30 = sshll.u32 %s811_s27, 4 }
  0x15   : > { %p43_p11 = scmp.eq.s32.totalorder %s42_s29, 0  ;;  %s154_s5 = scalar_lea.hbm %s931_s0, %s491_s28 }
  0x16   : > { %s155_s7 = sshll.u32 %s154_s5, 4  ;;  %s146_s8 = scalar_lea.vmem [#allocation2], %s489_s30  ;;  %s156_s7 = int_to_ptr.hbm [resolvable:$true] %s155_s7 }
  0x17   : > { %s820_s6 = scalar_select %p43_p11, %s702_s11, %s45_s21  }
  0x18   : > { %s157_s9 = sshll.u32 %s146_s8, 4  ;;  %p826_p12 = pnand %p516_p10, %p800_p6  ;;  %s158_s9 = int_to_ptr.vmem [resolvable:$true] %s157_s9 }
  0x19   : > { %p493_p13 = scmp.ge.s32.totalorder %s722_s16, 1  ;;  %s143_s20 = scalar_lea.sflag [#allocation3], %s811_s27 }
  0x1a   : > { %s724_s23 = smov 384   ;;  %s725_s21 = smov 128  }
  0x1b   : > { %s726_s25 = smov 8   ;;  %p186_p0 = scmp.lt.s32.totalorder %s722_s16, 5 }
  0x1c   : > { %512 = dma.hbm_to_vmem [thread:$0]  (!%p826_p12), %s156_s7, 256, %s158_s9, %s143_s20, %s724_s23, %s725_s21, %s726_s25  }
  0x1d   : > { %s177_s24 = scalar_lea.hbm %s932_s1, %s951_s22  ;;  %p187_p1 = pnand %p493_p13, %p186_p0 }
  0x1e   : > { %s179_s30 = sshll.u32 %s177_s24, 4  ;;  %s170_s3 = scalar_lea.vmem [#allocation4], %s811_s27  ;;  %s180_s30 = int_to_ptr.hbm [resolvable:$true] %s179_s30 }
  0x1f   : > { %s181_s4 = sshll.u32 %s170_s3, 4  ;;  %s168_s5 = scalar_lea.sflag [#allocation5], %s811_s27  ;;  %s182_s4 = int_to_ptr.vmem [resolvable:$true] %s181_s4 }
  0x20   : > { %515 = dma.hbm_to_vmem [thread:$0]  (!%p826_p12), %s180_s30, 16, %s182_s4, %s168_s5  }
  0x21   : > { %190 = sbr.rel (%p187_p1) target bundleno = 256 (0x100), region = 28  ;;  %s844_s8 = sand.u32 (!%p187_p1), 1, %s698_s10  }
  0x22   : > { %s494_s7 = sshll.u32 (!%p187_p1), %s844_s8, 4  ;;  %s193_s9 = scalar_lea.sflag (!%p187_p1), [#allocation3], %s844_s8 }
  0x23   : > { %s196_s20 = scalar_lea.vmem (!%p187_p1), [#allocation2], %s494_s7 }
  0x26   : > { %685 = dma.done.wait (%p805_p9), %s193_s9, 256  }
  0x27   : > { %687 = vsyncadd (%p805_p9), %s193_s9, 4294967040  ;;  %s203_s22 = scalar_lea.sflag [#allocation5], %s844_s8  ;;  %s205_s27 = scalar_lea.vmem [#allocation4], %s844_s8 }
  0x28   : > { %689 = dma.done.wait (%p805_p9), %s203_s22, 16  }
  0x29   : > { %691 = vsyncadd (%p805_p9), %s203_s22, 4294967280  ;;  %p239_p2 = scmp.lt.s32.totalorder %s710_s13, 1  ;;  %p497_p3 = scmp.ne.s32.totalorder %s706_s12, 0 }
  0x2b   : > { %s240_s17 = scalar_select %p239_p2, %s710_s13, 1 }
  0x2c   : > { %247 = sbr.rel (%p497_p3) target bundleno = 52 (0x34), region = 40 }
  0x2d   : > { %s504_s23 = sshll.u32 %s240_s17, 4 }
  0x2e   : > { %s863_s28 = scalar_lea.vmem %s933_s2, %s504_s23 }
  0x31   : > { %vm248_vm0 = vcmask 23552   ;;  %vm250_vm1 = vcmask 22528   ;;  %v727_v0 = vmov 0.0  }
  0x32   : > { %249 = vst.msk [vmem:[%s863_s28] sm:$0xff] %vm248_vm0, %v727_v0 }
  0x33   : > { %251 = vst.msk [vmem:[%s863_s28 + $0x8] sm:$0x7f] %vm250_vm1, %v727_v0 }
  0x34 PF: > { %v252_v1 = vld [vmem:[%s196_s20] sm:$0xff]  ;;  %v253_v2 = vld [vmem:[%s196_s20 + $0x8] sm:$0xff]  ;;  %v289_v12 = vlaneseq  ;;  %s499_s26 = sshll.u32 %s710_s13, 1  ;;  %v728_v52 = vmov 0.0  }
  0x35   : > { %v254_v3 = vmax.f32 %v252_v1, %v253_v2  ;;  %s312_s29 = sadd.s32 %s706_s12, %s499_s26  ;;  %v307_v46 = vld [vmem:[%s205_s27] sm:$0x1] }
  0x36   : > { %v868_v15 = vshrl.u32 %v289_v12, 7  ;;  %s500_s24 = sshll.u32 %s312_s29, 7  ;;  %v877_v34 = vand.u32 127, %v289_v12 }
  0x37   : > { %v255_v4 = vrot.slane %v254_v3, 4  ;;  %v316_v36 = vstv %s500_s24 }
  0x38   : > { %v871_v16 = vadd.s32 8, %v868_v15  ;;  %v317_v41 = vadd.s32 %v316_v36, %v877_v34  ;;  %v326_v57 = vcvt.s32.f32 %v868_v15 }
  0x39   : > { %v256_v5 = vmax.f32 %v254_v3, %v255_v4 }
  0x3a   : > { %vm318_vm12 = vcmp.lt.s32.totalorder %v317_v41, 300  ;;  %v327_v58 = vcvt.s32.f32 %v871_v16 }
  0x3b   : > { %v257_v6 = vrot.slane %v256_v5, 2 }
  0x3d   : > { %v258_v7 = vmax.f32 %v256_v5, %v257_v6 }
  0x3f   : > { %v259_v8 = vrot.slane %v258_v7, 1 }
  0x41   : > { %v260_v9 = vmax.f32 %v258_v7, %v259_v8 }
  0x43   : > { %v261_v10 = vsub.f32 %v252_v1, %v260_v9  ;;  %v262_v11 = vsub.f32 %v253_v2, %v260_v9  ;;  %vm292_vm2 = vcmp.eq.f32.partialorder %v252_v1, %v260_v9  ;;  %vm293_vm3 = vcmp.eq.f32.partialorder %v253_v2, %v260_v9 }
  0x44   : > { %v294_v17 = vsel %vm292_vm2, %v868_v15, 16  ;;  %v295_v18 = vsel %vm293_vm3, %v871_v16, 16  ;;  %vm338_vm2 = vcmask 1046528   ;;  %vm362_vm3 = vcmp.eq.s32.totalorder %v877_v34, 1 }
  0x45   : > { %v263_v13 = vmul.f32 1.442695, %v261_v10  ;;  %v265_v14 = vmul.f32 1.442695, %v262_v11  ;;  %vm296_vm4 = vcmp.lt.s32.totalorder %v294_v17, %v295_v18 }
  0x46   : > { %v297_v20 = vsel %vm296_vm4, %v294_v17, %v295_v18  ;;  %vm357_vm4 = vcmp.eq.s32.totalorder %v877_v34, 0 }
  0x47   : > { %586 = vpow2.f32 %v263_v13  ;;  %v298_v23 = vrot.slane %v297_v20, 4  ;;  %v376_v13 = vld [vmem:[%s863_s28] sm:$0xff] }
  0x48   : > { %588 = vpow2.f32 %v265_v14 }
  0x49   : > { %vm299_vm5 = vcmp.lt.s32.totalorder %v297_v20, %v298_v23 }
  0x4a   : > { %v300_v28 = vsel %vm299_vm5, %v297_v20, %v298_v23  ;;  %vm369_vm5 = vcmp.eq.s32.totalorder %v877_v34, 2  ;;  %v377_v23 = vld [vmem:[%s863_s28 + $0x8] sm:$0x7f] }
  0x4b   : > { %v301_v30 = vrot.slane %v300_v28, 2 }
  0x4d   : > { %v587_v19 = vpop.eup %586  ;;  %vm302_vm6 = vcmp.lt.s32.totalorder %v300_v28, %v301_v30 }
  0x4e   : > { %v589_v21 = vpop.eup %588  ;;  %v303_v32 = vsel %vm302_vm6, %v300_v28, %v301_v30  ;;  %vm380_vm6 = vcmask 23552  }
  0x4f   : > { %v267_v22 = vadd.f32 %v589_v21, %v587_v19  ;;  %v304_v37 = vrot.slane %v303_v32, 1 }
  0x51   : > { %v268_v24 = vrot.slane %v267_v22, 4  ;;  %vm305_vm9 = vcmp.lt.s32.totalorder %v303_v32, %v304_v37 }
  0x52   : > { %v306_v45 = vsel %vm305_vm9, %v303_v32, %v304_v37 }
  0x53   : > { %v269_v25 = vadd.f32 %v268_v24, %v267_v22  ;;  %vm308_vm13 = vcmp.eq.s32.totalorder %v306_v45, %v307_v46 }
  0x54   : > { %v498_v53 = vsel %vm308_vm13, 1.0, %v728_v52 }
  0x55   : > { %v270_v26 = vrot.slane %v269_v25, 2  ;;  %v320_v55 = vsel %vm318_vm12, %v498_v53, 0.0 }
  0x56   : > { %v349_v60 = vperm.slane %v320_v55, 0 }
  0x57   : > { %v271_v27 = vadd.f32 %v270_v26, %v269_v25 }
  0x59   : > { %v272_v29 = vrot.slane %v271_v27, 1 }
  0x5b   : > { %v273_v31 = vadd.f32 %v272_v29, %v271_v27 }
  0x5d   : > { %590 = vrcp.f32 %v273_v31  ;;  %v285_v38 = vand.u32 2147483648, %v273_v31  ;;  %vm279_vm7 = vweird.f32 %v273_v31  ;;  %v283_v40 = vand.u32 2147483647, %v273_v31 }
  0x5f   : > { %v286_v43 = vor.u32 1.1754944e-38, %v285_v38  ;;  %vm284_vm11 = vcmp.eq.f32.partialorder %v283_v40, 8.507059e+37 }
  0x63   : > { %v591_v33 = vpop.eup %590 }
  0x64   : > { %v275_v35 = vmul.f32 %v591_v33, %v273_v31  ;;  %vm280_vm8 = vweird.f32 %v591_v33 }
  0x65   : > { %vm281_vm10 = vmor %vm279_vm7, %vm280_vm8  ;;  %vm382_vm7 = vcmask 22528  }
  0x66   : > { %v276_v39 = vsub.f32 1.0, %v275_v35 }
  0x68   : > { %v277_v42 = vmul.f32 %v591_v33, %v276_v39 }
  0x6a   : > { %v278_v44 = vadd.f32 %v591_v33, %v277_v42 }
  0x6c   : > { %v282_v47 = vsel %vm281_vm10, %v591_v33, %v278_v44 }
  0x6d   : > { %v287_v48 = vsel %vm284_vm11, %v286_v43, %v282_v47 }
  0x6e   : > { %v319_v49 = vsel %vm318_vm12, %v287_v48, 0.0 }
  0x6f   : > { %v321_v50 = vmul.f32 15.0, %v319_v49 }
  0x71   : > { %v322_v51 = vceil.f32 %v321_v50 }
  0x73   : > { %v501_v54 = vadd.f32 -1.0, %v322_v51 }
  0x75   : > { %v324_v56 = vmax.f32 %v501_v54, 0.0 }
  0x77   : > { %v325_v59 = vmin.f32 %v324_v56, 14.0 }
  0x79   : > { %vm328_vm14 = vcmp.eq.f32.partialorder %v325_v59, %v326_v57  ;;  %vm329_vm15 = vcmp.eq.f32.partialorder %v325_v59, %v327_v58 }
  0x7a   : > { %vm332_vm0 = vmand %vm328_vm14, %vm318_vm12 }
  0x7b   : > { %v342_v61 = vsel %vm332_vm0, %v319_v49, 0.0  ;;  %v334_v62 = vsel %vm332_vm0, 1.0, %v728_v52  ;;  %v350_v63 = vsel %vm332_vm0, %v349_v60, 0.0  ;;  %vm333_vm1 = vmand %vm329_vm15, %vm318_vm12 }
  0x7c   : > { %344 = vadd.xlane.f32.xlu1 %v342_v61  ;;  %336 = vadd.xlane.f32.xlu0 %v334_v62  ;;  %v343_v0 = vsel %vm333_vm1, %v319_v49, 0.0  ;;  %v335_v1 = vsel %vm333_vm1, 1.0, %v728_v52  ;;  %v351_v2 = vsel %vm333_vm1, %v349_v60, 0.0 }
  0x7d   : > { %352 = vadd.xlane.f32.xlu2 %v350_v63  ;;  %v346_v3 = vsel %vm338_vm2, %v343_v0, 0.0  ;;  %v339_v4 = vsel %vm338_vm2, %v335_v1, 0.0  ;;  %v354_v5 = vsel %vm338_vm2, %v351_v2, 0.0 }
  0x84   : > { %347 = vadd.xlane.f32.xlu1 %v346_v3  ;;  %340 = vadd.xlane.f32.xlu0 %v339_v4 }
  0x85   : > { %355 = vadd.xlane.f32.xlu2 %v354_v5 }
  0xef   : > { %v345_v6 = vpop.xlane.xlu1 %344  ;;  %v337_v7 = vpop.xlane.xlu0 %336 }
  0xf0   : > { %v365_v8 = vsel %vm362_vm3, %v345_v6, 0.0  ;;  %v360_v9 = vsel %vm357_vm4, %v337_v7, 0.0  ;;  %v353_v10 = vpop.xlane.xlu2 %352 }
  0xf1   : > { %v367_v11 = vadd.f32 %v365_v8, %v360_v9  ;;  %v372_v12 = vsel %vm369_vm5, %v353_v10, 0.0 }
  0xf3   : > { %v374_v14 = vadd.f32 %v372_v12, %v367_v11 }
  0xf5   : > { %v378_v15 = vadd.f32 %v376_v13, %v374_v14 }
  0xf7   : > { %381 = vst.msk [vmem:[%s863_s28] sm:$0xff] %vm380_vm6, %v378_v15  ;;  %v348_v16 = vpop.xlane.xlu1 %347  ;;  %v341_v17 = vpop.xlane.xlu0 %340 }
  0xf8   : > { %v366_v18 = vsel %vm362_vm3, %v348_v16, 0.0  ;;  %v361_v19 = vsel %vm357_vm4, %v341_v17, 0.0  ;;  %v356_v20 = vpop.xlane.xlu2 %355 }
  0xf9   : > { %v368_v21 = vadd.f32 %v366_v18, %v361_v19  ;;  %v373_v22 = vsel %vm369_vm5, %v356_v20, 0.0 }
  0xfb   : > { %v375_v24 = vadd.f32 %v373_v22, %v368_v21 }
  0xfd   : > { %v379_v25 = vadd.f32 %v377_v23, %v375_v24 }
  0xff   : > { %383 = vst.msk [vmem:[%s863_s28 + $0x8] sm:$0x7f] %vm382_vm7, %v379_v25 }
 0x100 PF: > { %s18_s16 = sadd.s32 1, %s722_s16   ;;  %s937_s9 = smov %s698_s10 }
 0x101   : > { %p15_p4 = scmp.ge.s32.totalorder %s18_s16, 6   ;;  %s938_s10 = smov %s702_s11 }
 0x102   : > { %s939_s11 = smov %s820_s6  ;;  %s940_s12 = smov %s714_s14 }
 0x103   : > { %s941_s13 = smov %s718_s15  ;;  %s942_s14 = smov %s945_s18 }
 0x104   : > { %s943_s15 = smov %s949_s19  ;;  %17 = sbr.rel (!%p15_p4) target bundleno = 7 (0x7), region = 85 }
 0x109   :  { %405 = vsyncpa [#allocation3], 1 }
 0x10a   :  { %407 = vsyncpa [#allocation3 + $0x1], 1 }
 0x10b   :  { %408 = vsyncpa [#allocation5], 1 }
 0x10c   :  { %410 = vsyncpa [#allocation5 + $0x1], 1 }

</bundles_post_ra>
